<compile_context>
chip_gen: v5e
topology: v5e:2x2
jax: 0.10.0
libtpu: 0.0.40
codegen_flags: <defaults>
</compile_context>

<pallas_src>
import jax
import jax.numpy as jnp
from jax.experimental import pallas as pl
from jax.experimental.pallas import tpu as pltpu

LANE = 128
SUBLANE_BF16 = 16  # bf16-native (16, 128) tiling; also fine for the f32 x tile


def _round_up(n: int, m: int) -> int:
    return ((n + m - 1) // m) * m


def _policy_kernel(x_ref, w1_ref, b1_ref, w2_ref, b2_ref, w3_ref, b3_ref, o_ref):
    # In-kernel cast of the f32 x tile to bf16 (removes a standalone XLA cast
    # pass over x in HBM; hidden under DMA slack here).
    x = x_ref[...].astype(w1_ref.dtype)
    # h1 = relu(x @ W1 + b1)          (bf16 x bf16 -> f32 accumulate on MXU)
    h1 = jnp.dot(x, w1_ref[...], preferred_element_type=jnp.float32)
    h1 = jnp.maximum(h1 + b1_ref[...], 0.0)
    # h2 = relu(h1 @ W2 + b2)
    h2 = jnp.dot(h1.astype(w2_ref.dtype), w2_ref[...],
                 preferred_element_type=jnp.float32)
    h2 = jnp.maximum(h2 + b2_ref[...], 0.0)
    # logits = h2 @ W3 + b3  (padded b3 lanes are -1e30 -> masked out of softmax)
    logits = jnp.dot(h2.astype(w3_ref.dtype), w3_ref[...],
                     preferred_element_type=jnp.float32)
    logits = logits + b3_ref[...]
    # numerically-stable softmax over the lane-dense 128-wide slab
    m = jnp.max(logits, axis=-1, keepdims=True)
    e = jnp.exp(logits - m)
    denom = jnp.sum(e, axis=-1, keepdims=True)
    inv = 1.0 / denom          # exact reciprocal on a (tb, 1) vector: ~free,
    o_ref[...] = (e * inv).astype(o_ref.dtype)  # rows sum to 1 to f32 precision


def policy_network_forward(x, params, action_dim, *, batch_tile=1024,
                           out_dtype=jnp.bfloat16):
    """x: (batch, state_dim) or (state_dim,) float32.

    Returns (batch, action_dim) action probabilities in `out_dtype`
    (bf16 default for rollout collection; pass jnp.float32 for exact PPO
    importance ratios).
    """
    w1, b1, w2, b2, w3, b3 = params
    if x.ndim == 1:
        x = x[None, :]                       # torch unsqueeze(0) for 1-D input
    batch, state_dim = x.shape
    h1_dim = w1.shape[1]
    h2_dim = w2.shape[1]
    out_lanes = w3.shape[1]                  # action_dim padded to LANE multiple

    # Tile selection:
    #   tiny batches   -> single 16-aligned tile (grid of 1)
    #   medium batches -> split into >=2 even grid steps (v7x: both TCs busy)
    #   large batches  -> fixed 1024-row tile, 1-D grid over batch
    if batch <= 2 * SUBLANE_BF16:
        tb = _round_up(max(batch, 1), SUBLANE_BF16)
    elif batch <= 2 * batch_tile:
        tb = _round_up(pl.cdiv(batch, 2), SUBLANE_BF16)
    else:
        tb = batch_tile
    b_pad = _round_up(batch, tb)
    if b_pad != batch:
        x = jnp.pad(x, ((0, b_pad - batch), (0, 0)))

    grid = (b_pad // tb,)
    out = pl.pallas_call(
        _policy_kernel,
        out_shape=jax.ShapeDtypeStruct((b_pad, out_lanes), out_dtype),
        grid=grid,
        in_specs=[
            pl.BlockSpec((tb, state_dim), lambda i: (i, 0)),       # x tile (f32)
            pl.BlockSpec((state_dim, h1_dim), lambda i: (0, 0)),   # W1 (pinned)
            pl.BlockSpec((1, h1_dim), lambda i: (0, 0)),           # b1
            pl.BlockSpec((h1_dim, h2_dim), lambda i: (0, 0)),      # W2
            pl.BlockSpec((1, h2_dim), lambda i: (0, 0)),           # b2
            pl.BlockSpec((h2_dim, out_lanes), lambda i: (0, 0)),   # W3 (padded)
            pl.BlockSpec((1, out_lanes), lambda i: (0, 0)),        # b3 (padded)
        ],
        out_specs=pl.BlockSpec((tb, out_lanes), lambda i: (i, 0)),
        compiler_params=pltpu.CompilerParams(
            dimension_semantics=("parallel",),   # shard batch over v7x's 2 TCs
            vmem_limit_bytes=32 << 20,
        ),
    )(x, w1, b1, w2, b2, w3, b3)

    return out[:batch, :action_dim]


def init_params(key, state_dim, action_dim, param_dtype=jnp.bfloat16):
    """torch.nn.Linear-style init (U(-1/sqrt(fan_in), 1/sqrt(fan_in))).

    Weights are stored pre-transposed (in, out) in `param_dtype` (bf16 is
    MXU-native on v5e/v6e/v7x).  Biases are (1, out) float32.  The final layer
    is padded to a lane-dense multiple of 128 output columns: padded weight
    columns are 0 and padded bias lanes are -1e30 so the in-kernel softmax
    (which subtracts the row max first) ignores them.
    """
    dims = [(state_dim, 256), (256, 128), (128, action_dim)]
    out_lanes = _round_up(action_dim, LANE)
    params = []
    keys = jax.random.split(key, 2 * len(dims))
    for i, (fan_in, fan_out) in enumerate(dims):
        bound = 1.0 / float(fan_in) ** 0.5
        w = jax.random.uniform(keys[2 * i], (fan_in, fan_out), jnp.float32,
                               -bound, bound)
        b = jax.random.uniform(keys[2 * i + 1], (1, fan_out), jnp.float32,
                               -bound, bound)
        if i == len(dims) - 1 and fan_out != out_lanes:
            w = jnp.pad(w, ((0, 0), (0, out_lanes - fan_out)))
            b = jnp.pad(b, ((0, 0), (0, out_lanes - fan_out)),
                        constant_values=-1e30)
        params.extend([w.astype(param_dtype), b.astype(jnp.float32)])
    return tuple(params)


def _ref_forward(x, params, action_dim):
    """Pure-JAX reference using the same (bf16, padded) params."""
    w1, b1, w2, b2, w3, b3 = params
    if x.ndim == 1:
        x = x[None, :]
    xr = x.astype(w1.dtype)
    h1 = jnp.maximum(
        jnp.dot(xr, w1, preferred_element_type=jnp.float32) + b1, 0.0)
    h2 = jnp.maximum(
        jnp.dot(h1.astype(w2.dtype), w2, preferred_element_type=jnp.float32) + b2,
        0.0)
    logits = jnp.dot(h2.astype(w3.dtype), w3,
                     preferred_element_type=jnp.float32) + b3
    return jax.nn.softmax(logits[:, :action_dim], axis=-1)


if __name__ == "__main__":
    key = jax.random.PRNGKey(0)
    state_dim, action_dim, batch = 16, 8, 4

    k_params, k_x, k_x2 = jax.random.split(key, 3)
    params = init_params(k_params, state_dim, action_dim)
    x = jax.random.normal(k_x, (batch, state_dim), dtype=jnp.float32)

    ref = _ref_forward(x, params, action_dim)

    # --- f32 output path (exact PPO ratios) ---
    probs_f32 = policy_network_forward(x, params, action_dim,
                                       out_dtype=jnp.float32)
    jax.block_until_ready(probs_f32)
    assert probs_f32.shape == (batch, action_dim)
    assert probs_f32.dtype == jnp.float32
    assert bool(jnp.all(probs_f32 >= 0.0))
    assert bool(jnp.all(jnp.abs(jnp.sum(probs_f32, -1) - 1.0) < 1e-4))
    assert bool(jnp.allclose(probs_f32, ref, atol=5e-3, rtol=5e-3))

    # --- default bf16 output path (rollout collection) ---
    probs_bf16 = policy_network_forward(x, params, action_dim)
    jax.block_until_ready(probs_bf16)
    assert probs_bf16.shape == (batch, action_dim)
    assert probs_bf16.dtype == jnp.bfloat16
    assert bool(jnp.all(jnp.abs(jnp.sum(probs_bf16.astype(jnp.float32), -1) - 1.0)
                        < 2e-2))
    assert bool(jnp.allclose(probs_bf16.astype(jnp.float32), ref,
                             atol=2e-2, rtol=2e-2))

    # --- 1-D input path (matches torch unsqueeze(0)) ---
    probs1 = policy_network_forward(x[0], params, action_dim,
                                    out_dtype=jnp.float32)
    jax.block_until_ready(probs1)
    assert probs1.shape == (1, action_dim)
    assert bool(jnp.allclose(probs1, ref[:1], atol=5e-3, rtol=5e-3))

    # --- medium batch: exercises the >=2-step grid (both TCs on v7x) ---
    xm = jax.random.normal(k_x2, (600, state_dim), dtype=jnp.float32)
    probs_m = policy_network_forward(xm, params, action_dim,
                                     out_dtype=jnp.float32)
    jax.block_until_ready(probs_m)
    ref_m = _ref_forward(xm, params, action_dim)
    assert probs_m.shape == (600, action_dim)
    assert bool(jnp.all(jnp.abs(jnp.sum(probs_m, -1) - 1.0) < 1e-4))
    assert bool(jnp.allclose(probs_m, ref_m, atol=5e-3, rtol=5e-3))

    print("KERNEL_OK")
</pallas_src>

<mosaic_0001>
module attributes {stable_mosaic.version = 11 : i64} {
  func.func @_policy_kernel(%arg0: i32, %arg1: memref<16x16xf32, #tpu.memory_space<vmem>>, %arg2: memref<16x256xbf16, #tpu.memory_space<vmem>>, %arg3: memref<1x256xf32, #tpu.memory_space<vmem>>, %arg4: memref<256x128xbf16, #tpu.memory_space<vmem>>, %arg5: memref<1x128xf32, #tpu.memory_space<vmem>>, %arg6: memref<128x128xbf16, #tpu.memory_space<vmem>>, %arg7: memref<1x128xf32, #tpu.memory_space<vmem>>, %arg8: memref<16x128xf32, #tpu.memory_space<vmem>>) attributes {dimension_semantics = [#tpu.dimension_semantics<parallel>], iteration_bounds = array<i64: 1>, scalar_prefetch = 0 : i64, scratch_operands = 0 : i64, tpu.core_type = #tpu.core_type<tc>, window_params = [{transform_indices = @transform_0, window_bounds = array<i64: 16, 16>}, {pipeline_mode = #tpu.pipeline_mode<synchronous>, transform_indices = @transform_1, window_bounds = array<i64: 16, 256>}, {pipeline_mode = #tpu.pipeline_mode<synchronous>, transform_indices = @transform_2, window_bounds = array<i64: 1, 256>}, {pipeline_mode = #tpu.pipeline_mode<synchronous>, transform_indices = @transform_3, window_bounds = array<i64: 256, 128>}, {pipeline_mode = #tpu.pipeline_mode<synchronous>, transform_indices = @transform_4, window_bounds = array<i64: 1, 128>}, {pipeline_mode = #tpu.pipeline_mode<synchronous>, transform_indices = @transform_5, window_bounds = array<i64: 128, 128>}, {pipeline_mode = #tpu.pipeline_mode<synchronous>, transform_indices = @transform_6, window_bounds = array<i64: 1, 128>}, {transform_indices = @transform_7, window_bounds = array<i64: 16, 128>}]} {
    %c0 = arith.constant 0 : index
    %c0_0 = arith.constant 0 : index
    %0 = vector.load %arg1[%c0, %c0_0] : memref<16x16xf32, #tpu.memory_space<vmem>>, vector<16x16xf32>
    %1 = arith.truncf %0 : vector<16x16xf32> to vector<16x16xbf16>
    %c0_1 = arith.constant 0 : index
    %c0_2 = arith.constant 0 : index
    %2 = vector.load %arg2[%c0_1, %c0_2] : memref<16x256xbf16, #tpu.memory_space<vmem>>, vector<16x256xbf16>
    %cst = arith.constant dense<0.000000e+00> : vector<16x256xf32>
    %3 = tpu.matmul %1, %2, %cst {dimension_numbers = #tpu.dot_dimension_numbers<[1], [0], [0], [1], [0, 0, 1, 1], [], []>} : vector<16x16xbf16>, vector<16x256xbf16>, vector<16x256xf32> -> vector<16x256xf32>
    %c0_3 = arith.constant 0 : index
    %c0_4 = arith.constant 0 : index
    %4 = vector.load %arg3[%c0_3, %c0_4] : memref<1x256xf32, #tpu.memory_space<vmem>>, vector<1x256xf32>
    %5 = vector.broadcast %4 : vector<1x256xf32> to vector<16x256xf32>
    %6 = arith.addf %3, %5 : vector<16x256xf32>
    %cst_5 = arith.constant 0.000000e+00 : f32
    %7 = vector.broadcast %cst_5 : f32 to vector<16x256xf32>
    %8 = arith.maximumf %6, %7 : vector<16x256xf32>
    %9 = arith.truncf %8 : vector<16x256xf32> to vector<16x256xbf16>
    %c0_6 = arith.constant 0 : index
    %c0_7 = arith.constant 0 : index
    %10 = vector.load %arg4[%c0_6, %c0_7] : memref<256x128xbf16, #tpu.memory_space<vmem>>, vector<256x128xbf16>
    %cst_8 = arith.constant dense<0.000000e+00> : vector<16x128xf32>
    %11 = tpu.matmul %9, %10, %cst_8 {dimension_numbers = #tpu.dot_dimension_numbers<[1], [0], [0], [1], [0, 0, 1, 1], [], []>} : vector<16x256xbf16>, vector<256x128xbf16>, vector<16x128xf32> -> vector<16x128xf32>
    %c0_9 = arith.constant 0 : index
    %c0_10 = arith.constant 0 : index
    %12 = vector.load %arg5[%c0_9, %c0_10] : memref<1x128xf32, #tpu.memory_space<vmem>>, vector<1x128xf32>
    %13 = vector.broadcast %12 : vector<1x128xf32> to vector<16x128xf32>
    %14 = arith.addf %11, %13 : vector<16x128xf32>
    %cst_11 = arith.constant 0.000000e+00 : f32
    %15 = vector.broadcast %cst_11 : f32 to vector<16x128xf32>
    %16 = arith.maximumf %14, %15 : vector<16x128xf32>
    %17 = arith.truncf %16 : vector<16x128xf32> to vector<16x128xbf16>
    %c0_12 = arith.constant 0 : index
    %c0_13 = arith.constant 0 : index
    %18 = vector.load %arg6[%c0_12, %c0_13] : memref<128x128xbf16, #tpu.memory_space<vmem>>, vector<128x128xbf16>
    %cst_14 = arith.constant dense<0.000000e+00> : vector<16x128xf32>
    %19 = tpu.matmul %17, %18, %cst_14 {dimension_numbers = #tpu.dot_dimension_numbers<[1], [0], [0], [1], [0, 0, 1, 1], [], []>} : vector<16x128xbf16>, vector<128x128xbf16>, vector<16x128xf32> -> vector<16x128xf32>
    %c0_15 = arith.constant 0 : index
    %c0_16 = arith.constant 0 : index
    %20 = vector.load %arg7[%c0_15, %c0_16] : memref<1x128xf32, #tpu.memory_space<vmem>>, vector<1x128xf32>
    %21 = vector.broadcast %20 : vector<1x128xf32> to vector<16x128xf32>
    %22 = arith.addf %19, %21 : vector<16x128xf32>
    %cst_17 = arith.constant dense<0xFF800000> : vector<16xf32>
    %23 = vector.multi_reduction <maximumf>, %22, %cst_17 [1] : vector<16x128xf32> to vector<16xf32>
    %24 = vector.shape_cast %23 : vector<16xf32> to vector<16x1xf32>
    %25 = vector.broadcast %24 : vector<16x1xf32> to vector<16x128xf32>
    %26 = arith.subf %22, %25 : vector<16x128xf32>
    %27 = math.exp %26 : vector<16x128xf32>
    %cst_18 = arith.constant dense<0.000000e+00> : vector<16xf32>
    %28 = vector.multi_reduction <add>, %27, %cst_18 [1] : vector<16x128xf32> to vector<16xf32>
    %29 = vector.shape_cast %28 : vector<16xf32> to vector<16x1xf32>
    %cst_19 = arith.constant 1.000000e+00 : f32
    %30 = vector.broadcast %cst_19 : f32 to vector<16x1xf32>
    %31 = arith.divf %30, %29 : vector<16x1xf32>
    %32 = vector.broadcast %31 : vector<16x1xf32> to vector<16x128xf32>
    %33 = arith.mulf %27, %32 : vector<16x128xf32>
    %c0_20 = arith.constant 0 : index
    %c0_21 = arith.constant 0 : index
    %34 = vector.load %arg8[%c0_20, %c0_21] : memref<16x128xf32, #tpu.memory_space<vmem>>, vector<16x128xf32>
    tpu.vector_store %arg8[%c0_20, %c0_21], %33 {strides = array<i32>} : memref<16x128xf32, #tpu.memory_space<vmem>>, vector<16x128xf32>,
    return
  }
  func.func @transform_0(%arg0: i32) -> (i32, i32) {
    %c0_i32 = arith.constant 0 : i32
    %c0_i32_0 = arith.constant 0 : i32
    return %arg0, %c0_i32 : i32, i32
  }
  func.func @transform_1(%arg0: i32) -> (i32, i32) {
    %c0_i32 = arith.constant 0 : i32
    %c0_i32_0 = arith.constant 0 : i32
    %c0_i32_1 = arith.constant 0 : i32
    return %c0_i32, %c0_i32_0 : i32, i32
  }
  func.func @transform_2(%arg0: i32) -> (i32, i32) {
    %c0_i32 = arith.constant 0 : i32
    %c0_i32_0 = arith.constant 0 : i32
    %c0_i32_1 = arith.constant 0 : i32
    return %c0_i32, %c0_i32_0 : i32, i32
  }
  func.func @transform_3(%arg0: i32) -> (i32, i32) {
    %c0_i32 = arith.constant 0 : i32
    %c0_i32_0 = arith.constant 0 : i32
    %c0_i32_1 = arith.constant 0 : i32
    return %c0_i32, %c0_i32_0 : i32, i32
  }
  func.func @transform_4(%arg0: i32) -> (i32, i32) {
    %c0_i32 = arith.constant 0 : i32
    %c0_i32_0 = arith.constant 0 : i32
    %c0_i32_1 = arith.constant 0 : i32
    return %c0_i32, %c0_i32_0 : i32, i32
  }
  func.func @transform_5(%arg0: i32) -> (i32, i32) {
    %c0_i32 = arith.constant 0 : i32
    %c0_i32_0 = arith.constant 0 : i32
    %c0_i32_1 = arith.constant 0 : i32
    return %c0_i32, %c0_i32_0 : i32, i32
  }
  func.func @transform_6(%arg0: i32) -> (i32, i32) {
    %c0_i32 = arith.constant 0 : i32
    %c0_i32_0 = arith.constant 0 : i32
    %c0_i32_1 = arith.constant 0 : i32
    return %c0_i32, %c0_i32_0 : i32, i32
  }
  func.func @transform_7(%arg0: i32) -> (i32, i32) {
    %c0_i32 = arith.constant 0 : i32
    %c0_i32_0 = arith.constant 0 : i32
    return %arg0, %c0_i32 : i32, i32
  }
}

</mosaic_0001>

<bundles_post_ra>
// kernel: tpu_custom_call.1
= control target key start
LH: loop header
LB: loop body
LE: loop exit
PB: predicated region body
PF: predicated region fallthrough
CT: control target
= control target key end

     0   :  { %12 = vsyncpa [#allocation3], 0  ;;  %s864_s0 = inlined_call_operand.hbm [shape: f32[16,16], index: 0, kind: input, shape index: {}]   ;;  %s865_s1 = inlined_call_operand.hbm [shape: bf16[16,256], index: 1, kind: input, shape index: {}]   ;;  %s866_s2 = inlined_call_operand.hbm [shape: f32[1,256], index: 2, kind: input, shape index: {}]   ;;  %s867_s3 = inlined_call_operand.hbm [shape: bf16[256,128], index: 3, kind: input, shape index: {}]   ;;  %s868_s4 = inlined_call_operand.vmem [shape: f32[1,128], index: 4, kind: input, shape index: {}]   ;;  %s869_s5 = inlined_call_operand.hbm [shape: bf16[128,128], index: 5, kind: input, shape index: {}]   ;;  %s870_s6 = inlined_call_operand.vmem [shape: f32[1,128], index: 6, kind: input, shape index: {}]   ;;  %s871_s7 = inlined_call_operand.hbm [shape: f32[16,128], index: 7, kind: output, shape index: {}]  }
   0x1   :  { %13 = vsyncpa [#allocation6], 0 }
   0x2   :  { %14 = vsyncpa [#allocation9], 0 }
   0x3   :  { %15 = vsyncpa [#allocation4], 0  ;;  %s33_s26 = sshll.u32 %s865_s1, 4  ;;  %s781_s27 = smov [#allocation5]   ;;  %s34_s26 = int_to_ptr.hbm [resolvable:$true] %s33_s26 }
   0x4   :  { %s35_s28 = sshll.u32 %s781_s27, 4  ;;  %s57_s8 = sshll.u32 %s867_s3, 4  ;;  %s36_s28 = int_to_ptr.vmem [resolvable:$true] %s35_s28  ;;  %s58_s8 = int_to_ptr.hbm [resolvable:$true] %s57_s8 }
   0x5   :  { %s782_s9 = smov 128   ;;  %s783_s10 = smov 8  }
   0x6   :  { %41 = dma.hbm_to_vmem [thread:$0]  %s34_s26, 256, %s36_s28, [#allocation6], %s782_s9, %s782_s9, %s783_s10  }
   0x7   :  { %s784_s11 = smov [#allocation8]   ;;  %s785_s13 = smov 64  }
   0x8   :  { %s59_s12 = sshll.u32 %s784_s11, 4  ;;  %s786_s1 = smov 4   ;;  %s60_s12 = int_to_ptr.vmem [resolvable:$true] %s59_s12 }
   0x9   :  { %65 = dma.hbm_to_vmem [thread:$0]  %s58_s8, 2048, %s60_s12, [#allocation9], %s785_s13, %s785_s13, %s786_s1  }
   0xa   :  { %s20_s16 = sshll.u32 %s864_s0, 4  ;;  %s787_s17 = smov [#allocation2]   ;;  %s21_s16 = int_to_ptr.hbm [resolvable:$true] %s20_s16 }
   0xb   :  { %s22_s3 = sshll.u32 %s787_s17, 4  ;;  %s47_s20 = sshll.u32 %s866_s2, 4  ;;  %s23_s3 = int_to_ptr.vmem [resolvable:$true] %s22_s3  ;;  %s48_s20 = int_to_ptr.hbm [resolvable:$true] %s47_s20 }
   0xc   :  { %28 = dma.hbm_to_vmem [thread:$0]  %s21_s16, 256, %s23_s3, [#allocation3], %s782_s9, %s782_s9, %s783_s10  }
   0xd   :  { %s788_s21 = smov [#allocation7]   ;;  %s72_s25 = sshll.u32 %s869_s5, 4  ;;  %s73_s25 = int_to_ptr.hbm [resolvable:$true] %s72_s25 }
   0xe   :  { %s49_s22 = sshll.u32 %s788_s21, 4  ;;  %s789_s0 = smov [#allocation10]   ;;  %s50_s22 = int_to_ptr.vmem [resolvable:$true] %s49_s22 }
   0xf   :  { %52 = dma.hbm_to_vmem [thread:$0]  %s48_s20, 32, %s50_s22, [#allocation6]  }
  0x10   :  { %s74_s26 = sshll.u32 %s789_s0, 4  ;;  %s75_s26 = int_to_ptr.vmem [resolvable:$true] %s74_s26 }
  0x11   :  { %80 = dma.hbm_to_vmem [thread:$0]  %s73_s25, 1024, %s75_s26, [#allocation9], %s785_s13, %s785_s13, %s786_s1  }
  0x12   :  { %773 = dma.done.wait [#allocation3], 256  }
  0x13   :  { %774 = vsyncadd [#allocation3], 4294967040 }
  0x14   :  { %775 = dma.done.wait [#allocation6], 288  }
  0x15   :  { %776 = vsyncadd [#allocation6], 4294967008 }
  0x16   :  { %777 = dma.done.wait [#allocation9], 3072  }
  0x17   :  { %778 = vsyncadd [#allocation9], 4294964224  ;;  %v479_v0 = vld [vmem:[#allocation5] sm:$0xf]  ;;  %v584_v1 = vld [vmem:[#allocation5 + $0x4] sm:$0xf0] }
  0x18   :  { %v104_v2 = vld [vmem:[#allocation2] sm:$0xff]  ;;  %v480_v3 = vor.u32 %v584_v1, %v479_v0  ;;  %v105_v4 = vld [vmem:[#allocation2 + $0x8] sm:$0xff]  ;;  %v583_v5 = vld [vmem:[#allocation5 + $0x4] sm:$0xf]  ;;  %vm125_vm0 = vcmask 130048   ;;  %s462_s8 = sshll.u32 %s871_s7, 4  ;;  %s463_s8 = int_to_ptr.hbm [resolvable:$true] %s462_s8 }
  0x19   :  { %v481_v6 = vld [vmem:[#allocation5 + $0x8] sm:$0xf0]  ;;  %v106_v7 = vpack.c.bf16 %v105_v4, %v104_v2  ;;  %v591_v10 = vld [vmem:[#allocation8 + $0x30] sm:$0xff]  ;;  %v590_v11 = vld [vmem:[#allocation8 + $0x28] sm:$0xff] }
  0x1a   :  { %v484_v8 = vor.u32 %v583_v5, %v481_v6  ;;  %v592_v9 = vld [vmem:[#allocation8 + $0x38] sm:$0xff]  ;;  %136 = vmatpush.bf16.msra.mxu1 %v480_v3  ;;  %v589_v12 = vld [vmem:[#allocation8 + $0x20] sm:$0xff]  ;;  %v587_v15 = vld [vmem:[#allocation8 + $0x10] sm:$0xff] }
  0x1b   :  { %295 = vmatpush.bf16.msra.mxu2 %v592_v9  ;;  %v588_v13 = vld [vmem:[#allocation8 + $0x18] sm:$0xff]  ;;  %v599_v16 = vld [vmem:[#allocation8 + $0x70] sm:$0xff]  ;;  %v586_v17 = vld [vmem:[#allocation8 + $0x8] sm:$0xff] }
  0x1c   :  { %v600_v14 = vld [vmem:[#allocation8 + $0x78] sm:$0xff]  ;;  %v598_v18 = vld [vmem:[#allocation8 + $0x68] sm:$0xff]  ;;  %v585_v19 = vld [vmem:[#allocation8] sm:$0xff] }
  0x1d   :  { %485 = vmatmul.msk.bf16.vlgmr.msra.gmra.mxu1 %vm125_vm0, %v106_v7  ;;  %309 = vmatpush.bf16.msra.mxu3 %v600_v14  ;;  %v597_v20 = vld [vmem:[#allocation8 + $0x60] sm:$0xff]  ;;  %v596_v21 = vld [vmem:[#allocation8 + $0x58] sm:$0xff]  ;;  %v595_v22 = vld [vmem:[#allocation8 + $0x50] sm:$0xff] }
  0x1e   :  { %150 = vmatpush.bf16.msrb.mxu1 %v484_v8  ;;  %v594_v23 = vld [vmem:[#allocation8 + $0x48] sm:$0xff]  ;;  %v593_v24 = vld [vmem:[#allocation8 + $0x40] sm:$0xff]  ;;  %v109_v25 = vld [vmem:[#allocation7] sm:$0x3] }
  0x1f   :  { %296 = vmatpush.bf16.msra.mxu2 %v591_v10  ;;  %v111_v27 = vperm.slane %v109_v25, 0  ;;  %v112_v35 = vperm.slane %v109_v25, 1  ;;  %v608_v42 = vld [vmem:[#allocation10 + $0x38] sm:$0xff]  ;;  %v607_v43 = vld [vmem:[#allocation10 + $0x30] sm:$0xff]  ;;  %v606_v44 = vld [vmem:[#allocation10 + $0x28] sm:$0xff] }
  0x20   :  { %394 = vmatpush.bf16.msra.mxu0 %v608_v42  ;;  %v605_v45 = vld [vmem:[#allocation10 + $0x20] sm:$0xff]  ;;  %v604_v46 = vld [vmem:[#allocation10 + $0x18] sm:$0xff]  ;;  %v603_v47 = vld [vmem:[#allocation10 + $0x10] sm:$0xff] }
  0x21   :  { %310 = vmatpush.bf16.msra.mxu3 %v599_v16  ;;  %v602_v48 = vld [vmem:[#allocation10 + $0x8] sm:$0xff]  ;;  %v601_v49 = vld [vmem:[#allocation10] sm:$0xff]  ;;  %v619_v52 = vld [vmem:[%s868_s4] ss:$0 sm:$0xff]  ;;  %s790_s4 = smov [#allocation11]  }
  0x22   :  { %v620_v62 = vld [vmem:[%s870_s6] ss:$0 sm:$0xff]  ;;  %s460_s6 = sshll.u32 %s790_s4, 4  ;;  %s461_s6 = int_to_ptr.vmem [resolvable:$true] %s460_s6 }
  0x23   :  { %297 = vmatpush.bf16.msra.mxu2 %v590_v11 }
  0x24   :  { %395 = vmatpush.bf16.msra.mxu0 %v607_v43 }
  0x25   :  { %311 = vmatpush.bf16.msra.mxu3 %v598_v18 }
  0x27   :  { %298 = vmatpush.bf16.msra.mxu2 %v589_v12 }
  0x28   :  { %396 = vmatpush.bf16.msra.mxu0 %v606_v44 }
  0x29   :  { %312 = vmatpush.bf16.msra.mxu3 %v597_v20 }
  0x2b   :  { %299 = vmatpush.bf16.msra.mxu2 %v588_v13 }
  0x2c   :  { %397 = vmatpush.bf16.msra.mxu0 %v605_v45 }
  0x2d   :  { %486 = vmatmul.msk.bf16.vlgmr.msrb.gmra.mxu1 %vm125_vm0, %v106_v7  ;;  %313 = vmatpush.bf16.msra.mxu3 %v596_v21 }
  0x2f   :  { %300 = vmatpush.bf16.msra.mxu2 %v587_v15 }
  0x30   :  { %398 = vmatpush.bf16.msra.mxu0 %v604_v46 }
  0x31   :  { %314 = vmatpush.bf16.msra.mxu3 %v595_v22 }
  0x33   :  { %301 = vmatpush.bf16.msra.mxu2 %v586_v17 }
  0x34   :  { %399 = vmatpush.bf16.msra.mxu0 %v603_v47 }
  0x35   :  { %315 = vmatpush.bf16.msra.mxu3 %v594_v23 }
  0x37   :  { %302 = vmatpush.bf16.msra.mxu2 %v585_v19 }
  0x38   :  { %400 = vmatpush.bf16.msra.mxu0 %v602_v48 }
  0x39   :  { %316 = vmatpush.bf16.msra.mxu3 %v593_v24 }
  0x3c   :  { %401 = vmatpush.bf16.msra.mxu0 %v601_v49 }
  0x9a   :  { %v138_v26 = vpop.f32.mrf.mxu1 }
  0x9b   :  { %v139_v28 = vadd.f32 %v138_v26, %v111_v27 }
  0x9d   :  { %v157_v31 = vmax.f32 %v139_v28, 0.0 }
  0xa2   :  { %v140_v29 = vpop.f32.mrf.mxu1 }
  0xa3   :  { %v141_v30 = vadd.f32 %v140_v29, %v111_v27 }
  0xa5   :  { %v159_v32 = vmax.f32 %v141_v30, 0.0 }
  0xa7   :  { %v161_v33 = vpack.c.bf16 %v159_v32, %v157_v31 }
  0xa9   :  { %303 = vmatmul.bf16.vlgmr.msra.gmra.mxu2 %v161_v33 }
  0xaa   :  { %v152_v34 = vpop.f32.mrf.mxu1 }
  0xab   :  { %v153_v36 = vadd.f32 %v152_v34, %v112_v35 }
  0xad   :  { %v158_v39 = vmax.f32 %v153_v36, 0.0 }
  0xb2   :  { %v154_v37 = vpop.f32.mrf.mxu1 }
  0xb3   :  { %v155_v38 = vadd.f32 %v154_v37, %v112_v35 }
  0xb5   :  { %v160_v40 = vmax.f32 %v155_v38, 0.0 }
  0xb7   :  { %v162_v41 = vpack.c.bf16 %v160_v40, %v158_v39 }
  0xb9   :  { %317 = vmatmul.bf16.vlgmr.msra.gmra.mxu3 %v162_v41 }
 0x12c   :  { %v304_v50 = vpop.f32.mrf.mxu2 }
 0x12d   :  { %v305_v54 = vadd.f32 %v619_v52, %v304_v50 }
 0x134   :  { %v306_v53 = vpop.f32.mrf.mxu2 }
 0x135   :  { %v307_v55 = vadd.f32 %v619_v52, %v306_v53 }
 0x13c   :  { %v318_v51 = vpop.f32.mrf.mxu3 }
 0x13d   :  { %v319_v56 = vadd.f32 %v318_v51, %v305_v54 }
 0x13f   :  { %v323_v59 = vmax.f32 %v319_v56, 0.0 }
 0x144   :  { %v320_v57 = vpop.f32.mrf.mxu3 }
 0x145   :  { %v321_v58 = vadd.f32 %v320_v57, %v307_v55 }
 0x147   :  { %v324_v60 = vmax.f32 %v321_v58, 0.0 }
 0x149   :  { %v325_v61 = vpack.c.bf16 %v324_v60, %v323_v59 }
 0x14b   :  { %402 = vmatmul.bf16.vlgmr.msra.gmra.mxu0 %v325_v61 }
 0x1c8   :  { %v403_v63 = vpop.f32.mrf.mxu0 }
 0x1c9   :  { %v404_v0 = vadd.f32 %v620_v62, %v403_v63 }
 0x1cb   :  { %408 = vmax.xlane.f32.xlu0 %v404_v0 }
 0x1d0   :  { %v405_v1 = vpop.f32.mrf.mxu0 }
 0x1d1   :  { %v406_v2 = vadd.f32 %v620_v62, %v405_v1 }
 0x1d3   :  { %410 = vmax.xlane.f32.xlu0 %v406_v2 }
 0x23e   :  { %v409_v3 = vpop.xlane.xlu0 %408 }
 0x23f   :  { %v412_v4 = vsub.f32 %v404_v0, %v409_v3 }
 0x241   :  { %v414_v5 = vmul.f32 1.442695, %v412_v4 }
 0x243   :  { %621 = vpow2.f32 %v414_v5 }
 0x246   :  { %v411_v6 = vpop.xlane.xlu0 %410 }
 0x247   :  { %v413_v7 = vsub.f32 %v406_v2, %v411_v6 }
 0x249   :  { %v622_v8 = vpop.eup %621  ;;  %v416_v9 = vmul.f32 1.442695, %v413_v7 }
 0x24a   :  { %418 = vadd.xlane.f32.xlu1 %v622_v8 }
 0x24b   :  { %623 = vpow2.f32 %v416_v9 }
 0x251   :  { %v624_v10 = vpop.eup %623 }
 0x252   :  { %420 = vadd.xlane.f32.xlu1 %v624_v10 }
 0x2bd   :  { %v419_v11 = vpop.xlane.xlu1 %418 }
 0x2be   :  { %625 = vrcp.f32 %v419_v11  ;;  %v433_v16 = vand.u32 2147483648, %v419_v11  ;;  %v431_v18 = vand.u32 2147483647, %v419_v11  ;;  %vm427_vm2 = vweird.f32 %v419_v11 }
 0x2c0   :  { %v434_v21 = vor.u32 1.1754944e-38, %v433_v16  ;;  %vm432_vm4 = vcmp.eq.f32.partialorder %v431_v18, 8.507059e+37 }
 0x2c4   :  { %v626_v12 = vpop.eup %625 }
 0x2c5   :  { %v423_v13 = vmul.f32 %v626_v12, %v419_v11  ;;  %v421_v14 = vpop.xlane.xlu1 %420  ;;  %vm428_vm1 = vweird.f32 %v626_v12 }
 0x2c6   :  { %627 = vrcp.f32 %v421_v14  ;;  %vm429_vm3 = vmor %vm427_vm2, %vm428_vm1  ;;  %v448_v27 = vand.u32 2147483648, %v421_v14  ;;  %v446_v29 = vand.u32 2147483647, %v421_v14  ;;  %vm442_vm6 = vweird.f32 %v421_v14 }
 0x2c7   :  { %v424_v15 = vsub.f32 1.0, %v423_v13 }
 0x2c8   :  { %v449_v31 = vor.u32 1.1754944e-38, %v448_v27  ;;  %vm447_vm8 = vcmp.eq.f32.partialorder %v446_v29, 8.507059e+37 }
 0x2c9   :  { %v425_v17 = vmul.f32 %v626_v12, %v424_v15 }
 0x2cb   :  { %v426_v19 = vadd.f32 %v626_v12, %v425_v17 }
 0x2cc   :  { %v628_v20 = vpop.eup %627 }
 0x2cd   :  { %v438_v22 = vmul.f32 %v628_v20, %v421_v14  ;;  %v430_v23 = vsel %vm429_vm3, %v626_v12, %v426_v19  ;;  %vm443_vm5 = vweird.f32 %v628_v20 }
 0x2ce   :  { %v435_v24 = vsel %vm432_vm4, %v434_v21, %v430_v23  ;;  %vm444_vm7 = vmor %vm442_vm6, %vm443_vm5 }
 0x2cf   :  { %v439_v25 = vsub.f32 1.0, %v438_v22  ;;  %v452_v26 = vmul.f32 %v622_v8, %v435_v24 }
 0x2d1   :  { %v440_v28 = vmul.f32 %v628_v20, %v439_v25  ;;  %454 = vst [vmem:[#allocation11] sm:$0xff] %v452_v26 }
 0x2d3   :  { %v441_v30 = vadd.f32 %v628_v20, %v440_v28 }
 0x2d5   :  { %v445_v32 = vsel %vm444_vm7, %v628_v20, %v441_v30 }
 0x2d6   :  { %v450_v33 = vsel %vm447_vm8, %v449_v31, %v445_v32 }
 0x2d7   :  { %v453_v34 = vmul.f32 %v624_v10, %v450_v33 }
 0x2d9   :  { %455 = vst [vmem:[#allocation11 + $0x8] sm:$0xff] %v453_v34 }
 0x2da   :  { %468 = dma.vmem_to_hbm [thread:$0]  %s461_s6, 256, %s463_s8, [#allocation4], %s782_s9, %s782_s9, %s783_s10  }
 0x2db   :  { %779 = dma.done.wait [#allocation4], 256  }
 0x2dc   :  { %780 = vsyncadd [#allocation4], 4294967040 }
 0x2dd   :  { %473 = vsyncpa [#allocation3], 1 }
 0x2de   :  { %474 = vsyncpa [#allocation6], 1 }
 0x2df   :  { %475 = vsyncpa [#allocation9], 1 }
 0x2e0   :  { %476 = vsyncpa [#allocation4], 1 }

</bundles_post_ra>
